<compile_context>
chip_gen: v7x
topology: tpu7x:2x2x1
jax: 0.10.0
libtpu: 0.0.40
codegen_flags: <defaults>
</compile_context>

<pallas_src>
import math

import jax
import jax.numpy as jnp
from jax.experimental import pallas as pl
from jax.experimental.pallas import tpu as pltpu

_LANE = 128
_SUBLANE = 8


def _round_up(x, m):
    return ((x + m - 1) // m) * m


def siren_kernel(x_ref, wt_ref, b_ref, o_ref):
    # x_ref : (tm, dim_in)          row tile of the flattened input
    # wt_ref: (dim_in, dim_out_p)   w0-scaled, transposed, lane-padded weight (resident)
    # b_ref : (1, dim_out_p)        w0-scaled, lane-padded bias (f32, resident)
    # o_ref : (tm, dim_out_p)
    acc = jnp.dot(x_ref[...], wt_ref[...], preferred_element_type=jnp.float32)
    acc = acc + b_ref[...]                          # f32 bias add (broadcast row)
    o_ref[...] = jnp.sin(acc).astype(o_ref.dtype)   # w0 already folded into params


def siren_forward(x, weight, bias=None, *, w0=1.0, tm=1024, compute_dtype=None,
                  vmem_budget_bytes=40 * 1024 * 1024):
    """Siren layer forward: sin(w0 * (x @ weight.T + bias)).

    x: (..., dim_in); weight: (dim_out, dim_in); bias: (dim_out,) or None.
    compute_dtype: optional dtype for the MXU operands (e.g. jnp.bfloat16 on
    v6e/v7x); accumulation and the sin/bias epilogue stay in f32.
    """
    dim_out, dim_in = weight.shape
    lead = x.shape[:-1]
    out_dtype = x.dtype

    x2d = x.reshape(-1, dim_in)
    n = x2d.shape[0]

    # ---- parameter prep (plain-JAX glue, once per call) --------------------
    # Fold w0: sin(w0*(x W^T + b)) == sin(x (w0 W)^T + (w0 b)).
    wt = (w0 * weight).T                                     # (dim_in, dim_out)
    b = w0 * bias if bias is not None else jnp.zeros((dim_out,), jnp.float32)

    # Lane-dense output: pad dim_out up to a multiple of 128.
    dim_out_p = _round_up(dim_out, _LANE)
    if dim_out_p != dim_out:
        wt = jnp.pad(wt, ((0, 0), (0, dim_out_p - dim_out)))
        b = jnp.pad(b, (0, dim_out_p - dim_out))
    b2d = b.reshape(1, dim_out_p).astype(jnp.float32)

    # Optional reduced-precision MXU operands.
    if compute_dtype is not None:
        x2d = x2d.astype(compute_dtype)
        wt = wt.astype(compute_dtype)
    else:
        wt = wt.astype(x2d.dtype)
    in_itemsize = jnp.dtype(x2d.dtype).itemsize
    out_itemsize = jnp.dtype(out_dtype).itemsize

    # ---- tile-size selection -------------------------------------------------
    # Big row tiles amortize per-grid-step overhead; cap by the row count and by
    # a conservative VMEM budget (double-buffered in/out tiles + resident weight
    # + bias), chosen to fit comfortably under v7x's 64 MiB VMEM.
    tm_eff = max(_SUBLANE, min(_round_up(tm, _SUBLANE), _round_up(n, _SUBLANE)))
    weight_bytes = (2 * dim_in * dim_out_p * in_itemsize
                    + 2 * _SUBLANE * dim_out_p * 4)

    def tiles_bytes(t):
        return 2 * t * dim_in * in_itemsize + 2 * t * dim_out_p * out_itemsize

    while tm_eff > _SUBLANE and weight_bytes + tiles_bytes(tm_eff) > vmem_budget_bytes:
        tm_eff = max(_SUBLANE, _round_up(tm_eff // 2, _SUBLANE))

    # ---- ragged N: pad rows to a tile multiple -------------------------------
    n_pad = _round_up(max(n, 1), tm_eff)
    if n_pad != n:
        x2d = jnp.pad(x2d, ((0, n_pad - n), (0, 0)))
    grid = (n_pad // tm_eff,)

    vmem_limit = int(min(max(2 * (weight_bytes + tiles_bytes(tm_eff)), 16 << 20),
                         64 << 20))

    out = pl.pallas_call(
        siren_kernel,
        out_shape=jax.ShapeDtypeStruct((n_pad, dim_out_p), out_dtype),
        grid_spec=pltpu.PrefetchScalarGridSpec(
            num_scalar_prefetch=0,
            grid=grid,
            in_specs=[
                pl.BlockSpec((tm_eff, dim_in), lambda i: (i, 0)),
                pl.BlockSpec((dim_in, dim_out_p), lambda i: (0, 0)),  # resident weight
                pl.BlockSpec((1, dim_out_p), lambda i: (0, 0)),       # resident bias
            ],
            out_specs=pl.BlockSpec((tm_eff, dim_out_p), lambda i: (i, 0)),
        ),
        compiler_params=pltpu.CompilerParams(
            dimension_semantics=("parallel",),   # row tiles shard across TCs (v7x)
            vmem_limit_bytes=vmem_limit,
        ),
    )(x2d, wt, b2d)

    return out[:n, :dim_out].reshape(*lead, dim_out)


def init_siren_params(key, dim_in, dim_out, *, w0=1.0, c=6.0,
                      is_first=False, is_last=False, use_bias=True):
    """Deterministic re-implementation of Siren.__init__ weight init."""
    kw, kb = jax.random.split(key)
    if is_last:
        # Matches the PyTorch branch: only dim_out == 7 supported there.
        assert dim_out == 7, "Cannot support the dim out init for the last layer"
        weight = jnp.zeros((dim_out, dim_in), jnp.float32)
        bias = jnp.array([1, 0, 0, 0, 1, 1, 1], dtype=jnp.float32)
        return weight, bias
    w_std = (1.0 / dim_in) if is_first else (math.sqrt(c / dim_in) / w0)
    weight = jax.random.uniform(kw, (dim_out, dim_in), jnp.float32,
                                minval=-w_std, maxval=w_std)
    bias = (jax.random.uniform(kb, (dim_out,), jnp.float32,
                               minval=-w_std, maxval=w_std)
            if use_bias else None)
    return weight, bias


if __name__ == "__main__":
    key = jax.random.PRNGKey(0)
    k_x, k_p, k_x2 = jax.random.split(key, 3)

    # Hidden layer: batch=2, seq=8, dim_in=32 -> dim_out=32.
    batch, seq, dim_in, dim_out = 2, 8, 32, 32
    w0, c = 1.0, 6.0
    x = jax.random.normal(k_x, (batch, seq, dim_in), jnp.float32)
    weight, bias = init_siren_params(k_p, dim_in, dim_out, w0=w0, c=c)

    out = jax.block_until_ready(siren_forward(x, weight, bias, w0=w0))
    ref = jnp.sin(w0 * (x @ weight.T + bias))
    assert out.shape == (batch, seq, dim_out)
    assert jnp.allclose(out, ref, atol=1e-5, rtol=1e-5)

    # Ragged row count (exercises the row-padding path; no divisibility assert).
    x_r = jax.random.normal(k_x2, (3, 5, dim_in), jnp.float32)
    out_r = jax.block_until_ready(siren_forward(x_r, weight, bias, w0=w0))
    ref_r = jnp.sin(w0 * (x_r @ weight.T + bias))
    assert out_r.shape == (3, 5, dim_out)
    assert jnp.allclose(out_r, ref_r, atol=1e-5, rtol=1e-5)

    # Non-default w0 (exercises the w0-folding path).
    w0_big = 30.0
    out_w0 = jax.block_until_ready(siren_forward(x, weight, bias, w0=w0_big))
    ref_w0 = jnp.sin(w0_big * (x @ weight.T + bias))
    assert jnp.allclose(out_w0, ref_w0, atol=1e-4, rtol=1e-4)

    # use_bias=False path.
    w_nb, _ = init_siren_params(k_p, dim_in, dim_out, w0=w0, c=c, use_bias=False)
    out_nb = jax.block_until_ready(siren_forward(x, w_nb, None, w0=w0))
    ref_nb = jnp.sin(w0 * (x @ w_nb.T))
    assert jnp.allclose(out_nb, ref_nb, atol=1e-5, rtol=1e-5)

    # Last layer (dim_out=7): exercises lane-padding of a tiny output width.
    w_last, b_last = init_siren_params(k_p, dim_in, 7, w0=w0, c=c, is_last=True)
    out_last = jax.block_until_ready(siren_forward(x, w_last, b_last, w0=w0))
    ref_last = jnp.sin(w0 * (x @ w_last.T + b_last))
    assert out_last.shape == (batch, seq, 7)
    assert jnp.allclose(out_last, ref_last, atol=1e-5, rtol=1e-5)

    # bf16 MXU operands (recommended on v6e/v7x), f32 accumulate/epilogue.
    out_bf16 = jax.block_until_ready(
        siren_forward(x, weight, bias, w0=w0, compute_dtype=jnp.bfloat16))
    assert jnp.allclose(out_bf16, ref, atol=1e-1)

    print("KERNEL_OK")
</pallas_src>

<mosaic_0001>
module attributes {stable_mosaic.version = 11 : i64} {
  func.func @siren_kernel(%arg0: i32, %arg1: memref<16x32xf32, #tpu.memory_space<vmem>>, %arg2: memref<32x128xf32, #tpu.memory_space<vmem>>, %arg3: memref<1x128xf32, #tpu.memory_space<vmem>>, %arg4: memref<16x128xf32, #tpu.memory_space<vmem>>) attributes {dimension_semantics = [#tpu.dimension_semantics<parallel>], iteration_bounds = array<i64: 1>, scalar_prefetch = 0 : i64, scratch_operands = 0 : i64, tpu.core_type = #tpu.core_type<tc>, window_params = [{transform_indices = @transform_0, window_bounds = array<i64: 16, 32>}, {pipeline_mode = #tpu.pipeline_mode<synchronous>, transform_indices = @transform_1, window_bounds = array<i64: 32, 128>}, {pipeline_mode = #tpu.pipeline_mode<synchronous>, transform_indices = @transform_2, window_bounds = array<i64: 1, 128>}, {transform_indices = @transform_3, window_bounds = array<i64: 16, 128>}]} {
    %c0 = arith.constant 0 : index
    %c0_0 = arith.constant 0 : index
    %0 = vector.load %arg1[%c0, %c0_0] : memref<16x32xf32, #tpu.memory_space<vmem>>, vector<16x32xf32>
    %c0_1 = arith.constant 0 : index
    %c0_2 = arith.constant 0 : index
    %1 = vector.load %arg2[%c0_1, %c0_2] : memref<32x128xf32, #tpu.memory_space<vmem>>, vector<32x128xf32>
    %cst = arith.constant dense<0.000000e+00> : vector<16x128xf32>
    %2 = tpu.matmul %0, %1, %cst {dimension_numbers = #tpu.dot_dimension_numbers<[1], [0], [0], [1], [0, 0, 1, 1], [], []>} : vector<16x32xf32>, vector<32x128xf32>, vector<16x128xf32> -> vector<16x128xf32>
    %c0_3 = arith.constant 0 : index
    %c0_4 = arith.constant 0 : index
    %3 = vector.load %arg3[%c0_3, %c0_4] : memref<1x128xf32, #tpu.memory_space<vmem>>, vector<1x128xf32>
    %4 = vector.broadcast %3 : vector<1x128xf32> to vector<16x128xf32>
    %5 = arith.addf %2, %4 : vector<16x128xf32>
    %6 = math.sin %5 : vector<16x128xf32>
    %c0_5 = arith.constant 0 : index
    %c0_6 = arith.constant 0 : index
    %7 = vector.load %arg4[%c0_5, %c0_6] : memref<16x128xf32, #tpu.memory_space<vmem>>, vector<16x128xf32>
    tpu.vector_store %arg4[%c0_5, %c0_6], %6 {strides = array<i32>} : memref<16x128xf32, #tpu.memory_space<vmem>>, vector<16x128xf32>,
    return
  }
  func.func @transform_0(%arg0: i32) -> (i32, i32) {
    %c0_i32 = arith.constant 0 : i32
    %c0_i32_0 = arith.constant 0 : i32
    return %arg0, %c0_i32 : i32, i32
  }
  func.func @transform_1(%arg0: i32) -> (i32, i32) {
    %c0_i32 = arith.constant 0 : i32
    %c0_i32_0 = arith.constant 0 : i32
    %c0_i32_1 = arith.constant 0 : i32
    return %c0_i32, %c0_i32_0 : i32, i32
  }
  func.func @transform_2(%arg0: i32) -> (i32, i32) {
    %c0_i32 = arith.constant 0 : i32
    %c0_i32_0 = arith.constant 0 : i32
    %c0_i32_1 = arith.constant 0 : i32
    return %c0_i32, %c0_i32_0 : i32, i32
  }
  func.func @transform_3(%arg0: i32) -> (i32, i32) {
    %c0_i32 = arith.constant 0 : i32
    %c0_i32_0 = arith.constant 0 : i32
    return %arg0, %c0_i32 : i32, i32
  }
}

</mosaic_0001>

<bundles_post_ra>
// kernel: tpu_custom_call.1
= control target key start
LH: loop header
LB: loop body
LE: loop exit
PB: predicated region body
PF: predicated region fallthrough
CT: control target
= control target key end

     0   :  { %8 = vsyncpa [#allocation3], 0  ;;  %s642_s0 = inlined_call_operand.hbm [shape: f32[16,32], index: 0, kind: input, shape index: {}]   ;;  %s643_s1 = inlined_call_operand.hbm [shape: f32[32,128], index: 1, kind: input, shape index: {}]   ;;  %s644_s2 = inlined_call_operand.vmem [shape: f32[1,128], index: 2, kind: input, shape index: {}]   ;;  %s645_s3 = inlined_call_operand.hbm [shape: f32[16,128], index: 3, kind: output, shape index: {}]  }
   0x1   :  { %9 = vsyncpa [#allocation6], 0 }
   0x2   :  { %10 = vsyncpa [#allocation4], 0  ;;  %s501_s12 = smov [#allocation2]   ;;  %s429_s16 = scalar_lea.hbm %s642_s0, 256 }
   0x3   :  { %s16_s13 = sshll.u32 %s501_s12, 4  ;;  %p430_p0 = scmp.ne.s32.totalorder %s642_s0, %s429_s16  ;;  %s17_s13 = int_to_ptr.vmem [resolvable:$true] %s16_s13 }
   0x4   :  { %p433_p1 = scmp.lt.u32.totalorder %s429_s16, %s642_s0 }
   0x6   :  { %p435_p2 = pnand %p433_p1, %p430_p0 }
   0x8   :  { %438 = shalt.err (!%p435_p2)
}
   0x9   :  { %s439_s21 = scalar_lea.vmem %s17_s13, 256  ;;  %p444_p4 = scmp.lt.s32.totalorder %s17_s13, %s17_s13 }
   0xa   :  { %p440_p3 = scmp.ne.s32.totalorder %s17_s13, %s439_s21  ;;  %p445_p5 = scmp.lt.s32.totalorder %s439_s21, %s439_s21 }
   0xc   :  { %p446_p6 = por %p445_p5, %p444_p4 }
   0xe   :  { %p447_p7 = pnand %p446_p6, %p440_p3 }
  0x10   :  { %450 = shalt.err (!%p447_p7)
}
  0x11   :  { %s502_s22 = smov 128   ;;  %s503_s23 = smov 8  }
  0x12   :  { %22 = dma.hbm_to_vmem [thread:$0]  %s642_s0, 256, %s17_s13, [#allocation3], %s502_s22, %s502_s22, %s503_s23  }
  0x13   :  { %s504_s26 = smov [#allocation5]   ;;  %s451_s30 = scalar_lea.hbm %s643_s1, 512 }
  0x14   :  { %s28_s27 = sshll.u32 %s504_s26, 4  ;;  %p452_p8 = scmp.ne.s32.totalorder %s643_s1, %s451_s30  ;;  %s29_s27 = int_to_ptr.vmem [resolvable:$true] %s28_s27 }
  0x15   :  { %p455_p9 = scmp.lt.u32.totalorder %s451_s30, %s643_s1 }
  0x17   :  { %p457_p10 = pnand %p455_p9, %p452_p8 }
  0x19   :  { %460 = shalt.err (!%p457_p10)
}
  0x1a   :  { %s461_s8 = scalar_lea.vmem %s29_s27, 512  ;;  %p466_p12 = scmp.lt.s32.totalorder %s29_s27, %s29_s27 }
  0x1b   :  { %p462_p11 = scmp.ne.s32.totalorder %s29_s27, %s461_s8  ;;  %p467_p13 = scmp.lt.s32.totalorder %s461_s8, %s461_s8 }
  0x1d   :  { %p468_p0 = por %p467_p13, %p466_p12 }
  0x1f   :  { %p469_p1 = pnand %p468_p0, %p462_p11 }
  0x21   :  { %472 = shalt.err (!%p469_p1)
}
  0x22   :  { %34 = dma.hbm_to_vmem [thread:$0]  %s643_s1, 512, %s29_s27, [#allocation6], %s502_s22, %s502_s22, %s503_s23  }
  0x23   :  { %495 = dma.done.wait [#allocation3], 256  }
  0x24   :  { %496 = vsyncadd [#allocation3], 4294967040 }
  0x25   :  { %497 = dma.done.wait [#allocation6], 512  }
  0x26   :  { %498 = vsyncadd [#allocation6], 4294966784  ;;  %vm56_vm0 = vcmask 261120   ;;  %v45_v0 = vld [vmem:[#allocation5] sm:$0xff]  ;;  %v46_v1 = vld [vmem:[#allocation5 + $0x8] sm:$0xff] }
  0x27   :  { %v47_v2 = vld [vmem:[#allocation5 + $0x10] sm:$0xff]  ;;  %v394_v3 = vpack.c.bf16 %v46_v1, %v45_v0  ;;  %v48_v4 = vld [vmem:[#allocation5 + $0x18] sm:$0xff]  ;;  %v505_v33 = vmov 683565275   ;;  %v506_v37 = vmov 2475754826  }
  0x28   :  { %v43_v5 = vld [vmem:[#allocation2] sm:$0xff]  ;;  %v398_v6 = vpack.c.bf16 %v48_v4, %v47_v2  ;;  %v44_v7 = vld [vmem:[#allocation2 + $0x8] sm:$0xff]  ;;  %v507_v39 = vmov 2131351028   ;;  %v508_v41 = vmov 2102212464  }
  0x29   :  { %391 = vmatprep.mubr.msk.f32.mxu0 %vm56_vm0, %v43_v5  ;;  %395 = vmatprep.subr.bf16.mxu0 %v394_v3  ;;  %v366_v8 = vld [vmem:[%s644_s2] ss:$0 sm:$0xff]  ;;  %v509_v43 = vmov 920167782   ;;  %v510_v50 = vmov 1326507024  }
  0x2a   :  { %397 = vmatpush3.bf16.msra.mxu0 %v394_v3  ;;  %s511_s2 = smov [#allocation7]  }
  0x2b   :  { %399 = vmatprep.subr.bf16.mxu0 %v398_v6  ;;  %s353_s11 = sshll.u32 %s511_s2, 4  ;;  %s354_s11 = int_to_ptr.vmem [resolvable:$true] %s353_s11 }
  0x2c   :  { %s473_s12 = scalar_lea.vmem %s354_s11, 256  ;;  %p478_p3 = scmp.lt.s32.totalorder %s354_s11, %s354_s11 }
  0x2d   :  { %p474_p2 = scmp.ne.s32.totalorder %s354_s11, %s473_s12  ;;  %p479_p4 = scmp.lt.s32.totalorder %s473_s12, %s473_s12 }
  0x2e   :  { %401 = vmatpush3.bf16.msra.mxu0 %v398_v6 }
  0x2f   :  { %p480_p5 = por %p479_p4, %p478_p3 }
  0x31   :  { %392 = vmatmul.mubr.msk.f32.vlgmr.msra.gmra.mrb[0].mxu0 %vm56_vm0, %v44_v7  ;;  %p481_p6 = pnand %p480_p5, %p474_p2 }
 0x104   :  { %v393_v9 = vpop.f32.mrb[0].mxu0 }
 0x105   :  { %v565_v10 = vadd.f32 %v393_v9, %v366_v8  ;;  %v129_v11 = vpop.f32.mrb[1].mxu0 }
 0x106   :  { %v567_v12 = vadd.f32 %v366_v8, %v129_v11 }
 0x107   :  { %v242_v13 = vand.u32 2147483647, %v565_v10  ;;  %v245_v14 = vand.u32 2139095040, %v565_v10  ;;  %vm244_vm15 = vcmp.lt.s32.totalorder %v565_v10, 0 }
 0x108   :  { %v141_v15 = vand.u32 2139095040, %v567_v12  ;;  %v138_v18 = vand.u32 2147483647, %v567_v12 }
 0x109   :  { %v246_v16 = vshrl.u32 %v245_v14, 23  ;;  %v249_v17 = vand.u32 8388607, %v242_v13  ;;  %vm243_vm0 = vcmp.le.f32.partialorder %v242_v13, 0.7853982 }
 0x10a   :  { %v142_v19 = vshrl.u32 %v141_v15, 23  ;;  %v577_v24 = vand.u32 8388607, %v138_v18 }
 0x10b   :  { %v373_v20 = vadd.s32 4294967169, %v246_v16  ;;  %v250_v23 = vor.u32 8388608, %v249_v17 }
 0x10c   :  { %v369_v21 = vadd.s32 4294967169, %v142_v19  ;;  %v146_v31 = vor.u32 8388608, %v577_v24 }
 0x10d   :  { %v252_v22 = vadd.s32 1, %v373_v20  ;;  %v579_v30 = vshll.u32 %v250_v23, 8 }
 0x10e   :  { %v148_v25 = vadd.s32 1, %v369_v21 }
 0x10f   :  { %vm253_vm1 = vcmp.gt.s32.totalorder %v252_v22, 0 }
 0x110   :  { %v254_v26 = vsel %vm253_vm1, %v252_v22, 0  ;;  %vm149_vm2 = vcmp.gt.s32.totalorder %v148_v25, 0  ;;  %vm140_vm1 = vcmp.lt.s32.totalorder %v567_v12, 0 }
 0x111   :  { %v255_v27 = vshrl.u32 %v254_v26, 5  ;;  %v256_v28 = vand.u32 31, %v254_v26  ;;  %v150_v29 = vsel %vm149_vm2, %v148_v25, 0  ;;  %v186_v25 = vshll.u32 %v146_v31, 8 }
 0x112   :  { %v582_v35 = vshrl.u32 %v150_v29, 5  ;;  %v152_v36 = vand.u32 31, %v150_v29  ;;  %vm139_vm2 = vcmp.le.f32.partialorder %v138_v18, 0.7853982 }
 0x113   :  { %v257_v32 = vsub.s32 32, %v256_v28  ;;  %v259_v34 = vshll.u32 %v505_v33, %v256_v28  ;;  %v262_v38 = vshll.u32 %v506_v37, %v256_v28  ;;  %v265_v40 = vshll.u32 %v507_v39, %v256_v28 }
 0x114   :  { %v268_v42 = vshll.u32 %v508_v41, %v256_v28  ;;  %v271_v44 = vshll.u32 %v509_v43, %v256_v28  ;;  %vm274_vm3 = vcmp.lt.s32.totalorder %v255_v27, 1  ;;  %vm275_vm4 = vcmp.lt.s32.totalorder %v255_v27, 2 }
 0x115   :  { %v260_v45 = vshrl.u32 %v506_v37, %v257_v32  ;;  %v263_v46 = vshrl.u32 %v507_v39, %v257_v32  ;;  %v266_v47 = vshrl.u32 %v508_v41, %v257_v32  ;;  %v258_v48 = vshrl.u32 %v505_v33, %v257_v32 }
 0x116   :  { %v269_v49 = vshrl.u32 %v509_v43, %v257_v32  ;;  %v272_v51 = vshrl.u32 %v510_v50, %v257_v32  ;;  %v153_v55 = vsub.s32 32, %v152_v36  ;;  %vm276_vm5 = vcmp.lt.s32.totalorder %v255_v27, 3 }
 0x117   :  { %v261_v52 = vor.u32 %v260_v45, %v259_v34  ;;  %v264_v53 = vor.u32 %v263_v46, %v262_v38  ;;  %v267_v54 = vor.u32 %v266_v47, %v265_v40  ;;  %vm277_vm6 = vcmp.lt.s32.totalorder %v255_v27, 4 }
 0x118   :  { %v270_v56 = vor.u32 %v269_v49, %v268_v42  ;;  %v273_v57 = vor.u32 %v272_v51, %v271_v44  ;;  %v155_v1 = vshll.u32 %v505_v33, %v152_v36  ;;  %v156_v4 = vshrl.u32 %v506_v37, %v153_v55 }
 0x119   :  { %v278_v58 = vsel %vm274_vm3, %v258_v48, %v261_v52  ;;  %v279_v59 = vsel %vm277_vm6, %v267_v54, 2102212464  ;;  %v282_v60 = vsel %vm274_vm3, %v261_v52, %v264_v53  ;;  %v286_v61 = vsel %vm274_vm3, %v264_v53, %v267_v54 }
 0x11a   :  { %v280_v62 = vsel %vm276_vm5, %v264_v53, %v279_v59  ;;  %v283_v63 = vsel %vm277_vm6, %v270_v56, 920167782  ;;  %v287_v0 = vsel %vm277_vm6, %v273_v57, 1326507024  ;;  %v158_v5 = vshll.u32 %v506_v37, %v152_v36 }
 0x11b   :  { %v284_v2 = vsel %vm276_vm5, %v267_v54, %v283_v63  ;;  %v288_v3 = vsel %vm276_vm5, %v270_v56, %v287_v0  ;;  %v281_v6 = vsel %vm275_vm4, %v278_v58, %v280_v62  ;;  %v159_v9 = vshrl.u32 %v507_v39, %v153_v55 }
 0x11c   :  { %v285_v7 = vsel %vm275_vm4, %v282_v60, %v284_v2  ;;  %v289_v8 = vsel %vm275_vm4, %v286_v61, %v288_v3  ;;  %v157_v17 = vor.u32 %v156_v4, %v155_v1  ;;  %v161_v20 = vshll.u32 %v507_v39, %v152_v36 }
 0x11d   :  { %v591_v11 = vmul.u32.u64.low %v579_v30, %v289_v8  ;;  %v592_v14 = vmul.u32.u64.high %v579_v30, %v289_v8, %v591_v11  ;;  %v595_v15 = vmul.u32.u64.low %v579_v30, %v285_v7  ;;  %v596_v16 = vmul.u32.u64.high %v579_v30, %v285_v7, %v595_v15 }
 0x11e   :  { %v160_v19 = vor.u32 %v159_v9, %v158_v5  ;;  %v162_v21 = vshrl.u32 %v508_v41, %v153_v55  ;;  %v164_v22 = vshll.u32 %v508_v41, %v152_v36  ;;  %v165_v23 = vshrl.u32 %v509_v43, %v153_v55 }
 0x11f   :  { %v168_v24 = vshrl.u32 %v510_v50, %v153_v55  ;;  %v297_v26 = vmul.u32 %v579_v30, %v281_v6  ;;  %v154_v27 = vshrl.u32 %v505_v33, %v153_v55  ;;  %v167_v29 = vshll.u32 %v509_v43, %v152_v36 }
 0x120   :  { %v163_v28 = vor.u32 %v162_v21, %v161_v20  ;;  %vm299_vm7 = vc.u32 %v592_v14, %v595_v15  ;;  %v300_v32 = vadd.s32 1, %v596_v16  ;;  %v166_v34 = vor.u32 %v165_v23, %v164_v22 }
 0x121   :  { %vm170_vm8 = vcmp.lt.s32.totalorder %v582_v35, 1  ;;  %v169_v37 = vor.u32 %v168_v24, %v167_v29  ;;  %vm172_vm9 = vcmp.lt.s32.totalorder %v582_v35, 3  ;;  %vm173_vm10 = vcmp.lt.s32.totalorder %v582_v35, 4 }
 0x122   :  { %v178_v38 = vsel %vm170_vm8, %v157_v17, %v160_v19  ;;  %v301_v31 = vsel %vm299_vm7, %v300_v32, %v596_v16  ;;  %v175_v39 = vsel %vm173_vm10, %v163_v28, 2102212464  ;;  %v179_v30 = vsel %vm173_vm10, %v166_v34, 920167782 }
 0x123   :  { %v182_v33 = vsel %vm170_vm8, %v160_v19, %v163_v28  ;;  %v302_v40 = vadd.s32 %v301_v31, %v297_v26  ;;  %vm171_vm11 = vcmp.lt.s32.totalorder %v582_v35, 2  ;;  %v180_v36 = vsel %vm172_vm9, %v163_v28, %v179_v30 }
 0x124   :  { %v183_v41 = vsel %vm173_vm10, %v169_v37, 1326507024  ;;  %v174_v42 = vsel %vm170_vm8, %v154_v27, %v157_v17  ;;  %v176_v43 = vsel %vm172_vm9, %v160_v19, %v175_v39  ;;  %v181_v44 = vsel %vm171_vm11, %v178_v38, %v180_v36 }
 0x125   :  { %v184_v45 = vsel %vm172_vm9, %v166_v34, %v183_v41  ;;  %v303_v46 = vadd.s32 536870912, %v302_v40  ;;  %v606_v48 = vmul.u32.u64.low %v186_v25, %v181_v44  ;;  %v607_v49 = vmul.u32.u64.high %v186_v25, %v181_v44, %v606_v48 }
 0x126   :  { %v185_v47 = vsel %vm171_vm11, %v182_v33, %v184_v45  ;;  %v177_v53 = vsel %vm171_vm11, %v174_v42, %v176_v43  ;;  %v298_v5 = vadd.s32 %v595_v15, %v592_v14  ;;  %vm334_vm6 = vweird.f32 %v565_v10 }
 0x127   :  { %v609_v50 = vmul.u32.u64.low %v186_v25, %v185_v47  ;;  %v610_v51 = vmul.u32.u64.high %v186_v25, %v185_v47, %v609_v50  ;;  %v304_v52 = vshrl.u32 %v303_v46, 30  ;;  %v196_v55 = vadd.s32 1, %v607_v49 }
 0x128   :  { %v193_v35 = vmul.u32 %v186_v25, %v177_v53  ;;  %vm230_vm10 = vweird.f32 %v567_v12 }
 0x129   :  { %v305_v54 = vshll.u32 %v304_v52, 30  ;;  %vm195_vm12 = vc.u32 %v610_v51, %v606_v48  ;;  %v194_v26 = vadd.s32 %v606_v48, %v610_v51  ;;  %v328_v15 = vsub.s32 4, %v304_v52 }
 0x12a   :  { %v197_v57 = vsel %vm195_vm12, %v196_v55, %v607_v49 }
 0x12b   :  { %v306_v56 = vsub.s32 %v302_v40, %v305_v54  ;;  %v198_v58 = vadd.s32 %v197_v57, %v193_v35  ;;  %v329_v30 = vsel %vm244_vm15, %v328_v15, %v304_v52 }
 0x12c   :  { %v331_v42 = vsel %vm243_vm0, 0, %v329_v30 }
 0x12d   :  { %v308_v59 = vsub.s32 0, %v306_v56  ;;  %v199_v60 = vadd.s32 536870912, %v198_v58  ;;  %v335_v45 = vadd.s32 3, %v331_v42 }
 0x12f   :  { %v374_v61 = vmin.u32 %v308_v59, %v306_v56  ;;  %v200_v62 = vshrl.u32 %v199_v60, 30  ;;  %v336_v49 = vand.u32 3, %v335_v45 }
 0x131   :  { %v310_v63 = vclz %v374_v61  ;;  %v201_v0 = vshll.u32 %v200_v62, 30  ;;  %v224_v44 = vsub.s32 4, %v200_v62  ;;  %vm341_vm3 = vcmp.eq.s32.totalorder %v336_v49, 2 }
 0x132   :  { %vm338_vm4 = vcmp.eq.s32.totalorder %v336_v49, 0  ;;  %vm337_vm5 = vcmp.lt.s32.totalorder %v336_v49, 2 }
 0x133   :  { %v375_v1 = vadd.s32 4294967294, %v310_v63  ;;  %v202_v2 = vsub.s32 %v198_v58, %v201_v0  ;;  %v225_v47 = vsel %vm140_vm1, %v224_v44, %v200_v62 }
 0x134   :  { %v227_v51 = vsel %vm139_vm2, 0, %v225_v47 }
 0x135   :  { %vm376_vm13 = vcmp.lt.s32.totalorder %v375_v1, 0  ;;  %v204_v4 = vsub.s32 0, %v202_v2  ;;  %v231_v55 = vadd.s32 3, %v227_v51 }
 0x136   :  { %v313_v3 = vsel %vm376_vm13, 0, %v375_v1 }
 0x137   :  { %v314_v6 = vsub.s32 32, %v313_v3  ;;  %v318_v7 = vsub.s32 4294967266, %v313_v3  ;;  %v370_v8 = vmin.u32 %v204_v4, %v202_v2  ;;  %v315_v9 = vshll.u32 %v306_v56, %v313_v3 }
 0x138   :  { %v232_v58 = vand.u32 3, %v231_v55 }
 0x139   :  { %v316_v11 = vshrl.u32 %v298_v5, %v314_v6  ;;  %v319_v16 = vadd.s32 127, %v318_v7  ;;  %v206_v17 = vclz %v370_v8 }
 0x13a   :  { %vm237_vm7 = vcmp.eq.s32.totalorder %v232_v58, 2  ;;  %vm234_vm8 = vcmp.eq.s32.totalorder %v232_v58, 0  ;;  %vm233_vm9 = vcmp.lt.s32.totalorder %v232_v58, 2 }
 0x13b   :  { %v317_v19 = vor.u32 %v316_v11, %v315_v9  ;;  %v320_v20 = vshll.u32 %v319_v16, 23  ;;  %v371_v21 = vadd.s32 4294967294, %v206_v17 }
 0x13d   :  { %v321_v22 = vor.u32 4788187, %v320_v20  ;;  %vm372_vm14 = vcmp.lt.s32.totalorder %v371_v21, 0  ;;  %v324_v24 = vcvt.s32.f32 %v317_v19 }
 0x13e   :  { %v209_v25 = vsel %vm372_vm14, 0, %v371_v21 }
 0x13f   :  { %v322_v23 = vand.u32 2147483647, %v321_v22  ;;  %v210_v27 = vsub.s32 32, %v209_v25  ;;  %v214_v28 = vsub.s32 4294967266, %v209_v25  ;;  %v211_v29 = vshll.u32 %v202_v2, %v209_v25 }
 0x141   :  { %v325_v14 = vmul.f32 %v324_v24, %v322_v23  ;;  %v212_v32 = vshrl.u32 %v194_v26, %v210_v27  ;;  %v215_v34 = vadd.s32 127, %v214_v28 }
 0x143   :  { %v326_v37 = vxor.u32 2147483648, %v325_v14  ;;  %v213_v38 = vor.u32 %v212_v32, %v211_v29  ;;  %v216_v31 = vshll.u32 %v215_v34, 23 }
 0x145   :  { %v327_v39 = vsel %vm244_vm15, %v326_v37, %v325_v14  ;;  %v217_v40 = vor.u32 4788187, %v216_v31  ;;  %v220_v41 = vcvt.s32.f32 %v213_v38 }
 0x146   :  { %v330_v33 = vsel %vm243_vm0, %v565_v10, %v327_v39 }
 0x147   :  { %421 = vcosq.f32 %v330_v33  ;;  %v218_v36 = vand.u32 2147483647, %v217_v40 }
 0x148   :  { %423 = vsinq.f32 %v330_v33 }
 0x149   :  { %v221_v43 = vmul.f32 %v220_v41, %v218_v36 }
 0x14b   :  { %v222_v46 = vxor.u32 2147483648, %v221_v43 }
 0x14d   :  { %v223_v13 = vsel %vm140_vm1, %v222_v46, %v221_v43 }
 0x14e   :  { %v226_v48 = vsel %vm139_vm2, %v567_v12, %v223_v13 }
 0x14f   :  { %425 = vcosq.f32 %v226_v48 }
 0x150   :  { %427 = vsinq.f32 %v226_v48 }
 0x151   :  { %v422_v50 = vpop.eup %421 }
 0x152   :  { %v424_v52 = vpop.eup %423  ;;  %v342_v53 = vxor.u32 2147483648, %v422_v50 }
 0x153   :  { %v339_v54 = vxor.u32 2147483648, %v424_v52 }
 0x154   :  { %v343_v35 = vsel %vm341_vm3, %v342_v53, %v424_v52 }
 0x155   :  { %v340_v56 = vsel %vm338_vm4, %v422_v50, %v339_v54 }
 0x156   :  { %v344_v18 = vsel %vm337_vm5, %v340_v56, %v343_v35 }
 0x157   :  { %v345_v57 = vsel %vm334_vm6, nan, %v344_v18 }
 0x158   :  { %347 = vst [vmem:[#allocation7 + $0x8] sm:$0xff] %v345_v57 }
 0x159   :  { %v426_v59 = vpop.eup %425 }
 0x15a   :  { %v428_v60 = vpop.eup %427  ;;  %v238_v61 = vxor.u32 2147483648, %v426_v59 }
 0x15b   :  { %v235_v62 = vxor.u32 2147483648, %v428_v60 }
 0x15c   :  { %v239_v63 = vsel %vm237_vm7, %v238_v61, %v428_v60 }
 0x15d   :  { %v236_v0 = vsel %vm234_vm8, %v426_v59, %v235_v62 }
 0x15e   :  { %v240_v1 = vsel %vm233_vm9, %v236_v0, %v239_v63 }
 0x15f   :  { %v241_v10 = vsel %vm230_vm10, nan, %v240_v1 }
 0x160   :  { %346 = vst [vmem:[#allocation7] sm:$0xff] %v241_v10 }
 0x161   :  { %484 = shalt.err (!%p481_p6)
}
 0x162   :  { %s485_s15 = scalar_lea.hbm %s645_s3, 256 }
 0x163   :  { %p486_p7 = scmp.ne.s32.totalorder %s645_s3, %s485_s15  ;;  %p489_p8 = scmp.lt.u32.totalorder %s485_s15, %s645_s3 }
 0x165   :  { %p491_p9 = pnand %p489_p8, %p486_p7 }
 0x167   :  { %494 = shalt.err (!%p491_p9)
}
 0x168   :  { %359 = dma.vmem_to_hbm [thread:$0]  %s354_s11, 256, %s645_s3, [#allocation4], %s502_s22, %s502_s22, %s503_s23  }
 0x169   :  { %499 = dma.done.wait [#allocation4], 256  }
 0x16a   :  { %500 = vsyncadd [#allocation4], 4294967040 }
 0x16b   :  { %363 = vsyncpa [#allocation3], 1 }
 0x16c   :  { %364 = vsyncpa [#allocation6], 1 }
 0x16d   :  { %365 = vsyncpa [#allocation4], 1 }

</bundles_post_ra>
